<compile_context>
chip_gen: v7x
topology: tpu7x:2x2x1
jax: 0.10.0
libtpu: 0.0.40
codegen_flags: <defaults>
</compile_context>

<pallas_src>
import functools

import jax
import jax.numpy as jnp
from jax import lax
from jax.experimental import pallas as pl
from jax.experimental.pallas import tpu as pltpu

_LANES = 128
_SUBLANES = 8
_CHUNK_VREGS = 16                 # ~16 f32 vregs per in-kernel chunk
_BUF_BYTES = 8 * 1024 * 1024      # VMEM bytes per (double-buffered) input block
_VMEM_LIMIT = 32 * 1024 * 1024    # scoped VMEM limit handed to Mosaic
_MAX_L = 2048                     # max lane width considered for the 2-D view
_MIN_LANE_EFF = 0.25              # below this, use the sliced-prefix fallback
_UNROLL = 4


def _round_up(x, m):
    return (x + m - 1) // m * m


def _best_lane_divisor(total):
    """Best divisor L <= _MAX_L of `total` for a free (total//L, L) view.

    Lane efficiency = L / round_up(L, 128), i.e. how full the 128-wide vregs
    are.  Returns None when even the best divisor wastes too many lanes.
    """
    best_eff, best_d = -1.0, None
    for d in range(1, min(total, _MAX_L) + 1):
        if total % d:
            continue
        eff = d / _round_up(d, _LANES)
        if eff >= best_eff:
            best_eff, best_d = eff, d
    if best_d is None or best_eff < _MIN_LANE_EFF:
        return None
    return best_d


def _abs_sum_kernel(x_ref, out_ref, *, n_rows, block_rows, chunk_rows,
                    n_chunks, ragged):
    """Accumulate sum(|x|) of this (block_rows, L) block into out_ref.

    out_ref is a (chunk_rows, L) f32 accumulator that stays resident across
    the whole (sequential) grid; the single tiny cross-lane reduce happens in
    the wrapper.  Interior blocks are a pure `acc += |x|` stream; only the
    last block of a ragged row count runs the masked variant (pl.when-gated).
    """
    i = pl.program_id(0)

    @pl.when(i == 0)
    def _():
        out_ref[...] = jnp.zeros_like(out_ref)

    zero = jnp.zeros(out_ref.shape, jnp.float32)
    unroll = min(_UNROLL, n_chunks)

    def fast_chunk(j, acc):
        r0 = pl.multiple_of(j * chunk_rows, _SUBLANES)
        x = x_ref[pl.ds(r0, chunk_rows), :]
        return acc + jnp.abs(x.astype(jnp.float32))

    if not ragged:
        acc = lax.fori_loop(0, n_chunks, fast_chunk, zero, unroll=unroll)
        out_ref[...] += acc
    else:
        last = pl.num_programs(0) - 1

        def masked_chunk(j, acc):
            r0 = pl.multiple_of(j * chunk_rows, _SUBLANES)
            x = x_ref[pl.ds(r0, chunk_rows), :]
            row_ids = (i * block_rows + r0
                       + lax.broadcasted_iota(jnp.int32, x.shape, 0))
            # Rows past n_rows are Pallas padding (undefined data); zero them.
            return acc + jnp.where(row_ids < n_rows,
                                   jnp.abs(x.astype(jnp.float32)), 0.0)

        @pl.when(i != last)
        def _():
            acc = lax.fori_loop(0, n_chunks, fast_chunk, zero, unroll=unroll)
            out_ref[...] += acc

        @pl.when(i == last)
        def _():
            acc = lax.fori_loop(0, n_chunks, masked_chunk, zero, unroll=unroll)
            out_ref[...] += acc


def _abs_sum_2d(x2d):
    """sum(|x2d|) as an f32 scalar, streaming x2d HBM -> VMEM exactly once."""
    rows, L = x2d.shape
    itemsize = jnp.dtype(x2d.dtype).itemsize
    lanes_padded = _round_up(L, _LANES)
    vregs_per_8_rows = lanes_padded // _LANES
    chunk_rows = _SUBLANES * max(1, _CHUNK_VREGS // vregs_per_8_rows)

    if rows <= chunk_rows:
        # Small input: one block, one chunk, no masking, single grid step.
        chunk_rows = rows
        block_rows = rows
    else:
        # Dtype-aware block size: ~_BUF_BYTES of VMEM per input buffer.
        budget_rows = _BUF_BYTES // (lanes_padded * itemsize)
        budget_rows = max(chunk_rows, budget_rows // chunk_rows * chunk_rows)
        block_rows = min(budget_rows, rows // chunk_rows * chunk_rows)

    num_blocks = pl.cdiv(rows, block_rows)
    n_chunks = block_rows // chunk_rows
    ragged = (rows % block_rows) != 0

    kernel = functools.partial(
        _abs_sum_kernel,
        n_rows=rows,
        block_rows=block_rows,
        chunk_rows=chunk_rows,
        n_chunks=n_chunks,
        ragged=ragged,
    )

    out = pl.pallas_call(
        kernel,
        out_shape=jax.ShapeDtypeStruct((chunk_rows, L), jnp.float32),
        grid=(num_blocks,),
        in_specs=[pl.BlockSpec((block_rows, L), lambda i: (i, 0))],
        out_specs=pl.BlockSpec((chunk_rows, L), lambda i: (0, 0)),
        compiler_params=pltpu.CompilerParams(
            dimension_semantics=("arbitrary",),
            vmem_limit_bytes=_VMEM_LIMIT,
        ),
    )(x2d)

    # Final tiny reduce (<= ~16 vregs) in the wrapper.
    return jnp.sum(out)


def verts_reg_loss(expression_offset, verts_regularizer_weight):
    """Pallas implementation of VertsRegLoss.forward.

    NOTE: like the PyTorch module, the weight comes from a plain config value
    and the `> 0.0` branch is resolved on the host, so it must be a concrete
    (non-traced) number.  The weight<=0 branch returns a Python 0.0 to mirror
    the module's `return 0.0`.
    """
    weight = float(verts_regularizer_weight)
    if weight <= 0.0:
        return 0.0

    B, N, C = expression_offset.shape
    # weight * mean(sum(|x|, dim=2)) == weight / (B*N) * sum(|x|)
    scale = weight / float(B * N)
    total = B * N * C

    flat = expression_offset.reshape(-1)          # contiguous reshape: free

    L = _best_lane_divisor(total)
    if L is not None:
        # Zero-copy path: reinterpret the flat buffer as (total//L, L).  The
        # reshape of contiguous row-major data is a bitcast, so the kernel
        # streams the original HBM bytes exactly once.
        return _abs_sum_2d(flat.reshape(total // L, L)) * scale

    # Awkward totals (no divisor fills the lanes reasonably, e.g. 3 * prime):
    # reduce the largest 128-aligned prefix with the kernel and the (<128
    # element) tail with plain jnp.  The prefix slice costs one extra
    # read+write of the tensor.
    # TODO(synk): make this path zero-copy too (1-D blocks or pl.ANY +
    # manual make_async_copy) once 1-D / dynamic-lane layouts are validated.
    rem = total % _LANES
    main = total - rem
    tail = (jnp.sum(jnp.abs(flat[main:]).astype(jnp.float32))
            if rem else jnp.float32(0.0))
    if main == 0:
        return tail * scale
    return (_abs_sum_2d(flat[:main].reshape(-1, _LANES)) + tail) * scale


if __name__ == "__main__":
    key = jax.random.PRNGKey(0)
    weight = 0.01

    def ref_loss(x):
        return weight * jnp.mean(jnp.sum(jnp.abs(x), axis=2))

    # 1) Small shape consistent with the module: (batch, n_verts, 3).
    #    total=384 has an exact lane-friendly divisor -> zero-copy, one block.
    x_small = jax.random.normal(key, (2, 64, 3), dtype=jnp.float32)
    out_small = jax.block_until_ready(verts_reg_loss(x_small, weight))
    assert jnp.allclose(out_small, ref_loss(x_small), rtol=1e-5, atol=1e-6), (
        out_small, ref_loss(x_small))

    # 2) Medium shape: exercises the multi-block grid, the pl.when-gated
    #    ragged-row mask on the last block, and a non-128 lane divisor
    #    (L=2000) -- all zero-copy.
    key2, key3 = jax.random.split(key)
    x_med = jax.random.normal(key2, (2, 35000, 3), dtype=jnp.float32)
    out_med = jax.block_until_ready(verts_reg_loss(x_med, weight))
    assert jnp.allclose(out_med, ref_loss(x_med), rtol=2e-4, atol=1e-6), (
        out_med, ref_loss(x_med))

    # 3) FLAME-like vertex count (5023): 3*5023 has no usable divisor, so this
    #    exercises the sliced-prefix fallback + jnp tail.
    x_flame = jax.random.normal(key3, (1, 5023, 3), dtype=jnp.float32)
    out_flame = jax.block_until_ready(verts_reg_loss(x_flame, weight))
    assert jnp.allclose(out_flame, ref_loss(x_flame), rtol=1e-4, atol=1e-6), (
        out_flame, ref_loss(x_flame))

    # 4) Zero-weight branch returns a plain 0.0, like the module.
    assert verts_reg_loss(x_small, 0.0) == 0.0

    print("KERNEL_OK")
</pallas_src>

<mosaic_0001>
module attributes {stable_mosaic.version = 11 : i64} {
  func.func @_abs_sum_kernel(%arg0: i32, %arg1: memref<1x384xf32, #tpu.memory_space<vmem>>, %arg2: memref<1x384xf32, #tpu.memory_space<vmem>>) attributes {dimension_semantics = [#tpu.dimension_semantics<arbitrary>], iteration_bounds = array<i64: 1>, scalar_prefetch = 0 : i64, scratch_operands = 0 : i64, tpu.core_type = #tpu.core_type<tc>, window_params = [{transform_indices = @transform_0, window_bounds = array<i64: 1, 384>}, {pipeline_mode = #tpu.pipeline_mode<synchronous>, transform_indices = @transform_1, window_bounds = array<i64: 1, 384>}]} {
    %c0_i32 = arith.constant 0 : i32
    %0 = arith.cmpi eq, %arg0, %c0_i32 : i32
    %1 = arith.extui %0 : i1 to i32
    %c0_i32_0 = arith.constant 0 : i32
    %2 = arith.cmpi ne, %1, %c0_i32_0 : i32
    scf.if %2 {
      %cst_7 = arith.constant 0.000000e+00 : f32
      %13 = vector.broadcast %cst_7 : f32 to vector<1x384xf32>
      %c0_8 = arith.constant 0 : index
      %c0_9 = arith.constant 0 : index
      %14 = vector.load %arg2[%c0_8, %c0_9] : memref<1x384xf32, #tpu.memory_space<vmem>>, vector<1x384xf32>
      tpu.vector_store %arg2[%c0_8, %c0_9], %13 {strides = array<i32>} : memref<1x384xf32, #tpu.memory_space<vmem>>, vector<1x384xf32>,
    } else {
    }
    %cst = arith.constant 0.000000e+00 : f32
    %3 = vector.broadcast %cst : f32 to vector<1x384xf32>
    %c0_i32_1 = arith.constant 0 : i32
    %c1_i32 = arith.constant 1 : i32
    %4 = arith.muli %c0_i32_1, %c1_i32 : i32
    %5 = tpu.assume_multiple %4, 8 : i32
    %6 = arith.index_cast %5 : i32 to index
    %c0 = arith.constant 0 : index
    %7 = vector.load %arg1[%6, %c0] : memref<1x384xf32, #tpu.memory_space<vmem>>, vector<1x384xf32>
    %8 = math.absf %7 : vector<1x384xf32>
    %9 = arith.addf %3, %8 : vector<1x384xf32>
    %c1_i32_2 = arith.constant 1 : i32
    %c0_3 = arith.constant 0 : index
    %c0_4 = arith.constant 0 : index
    %10 = vector.load %arg2[%c0_3, %c0_4] : memref<1x384xf32, #tpu.memory_space<vmem>>, vector<1x384xf32>
    %11 = arith.addf %10, %9 : vector<1x384xf32>
    %c0_5 = arith.constant 0 : index
    %c0_6 = arith.constant 0 : index
    %12 = vector.load %arg2[%c0_5, %c0_6] : memref<1x384xf32, #tpu.memory_space<vmem>>, vector<1x384xf32>
    tpu.vector_store %arg2[%c0_5, %c0_6], %11 {strides = array<i32>} : memref<1x384xf32, #tpu.memory_space<vmem>>, vector<1x384xf32>,
    return
  }
  func.func @transform_0(%arg0: i32) -> (i32, i32) {
    %c0_i32 = arith.constant 0 : i32
    %c0_i32_0 = arith.constant 0 : i32
    return %arg0, %c0_i32 : i32, i32
  }
  func.func @transform_1(%arg0: i32) -> (i32, i32) {
    %c0_i32 = arith.constant 0 : i32
    %c0_i32_0 = arith.constant 0 : i32
    %c0_i32_1 = arith.constant 0 : i32
    return %c0_i32, %c0_i32_0 : i32, i32
  }
}

</mosaic_0001>

<bundles_post_ra>
// kernel: tpu_custom_call.1
= control target key start
LH: loop header
LB: loop body
LE: loop exit
PB: predicated region body
PF: predicated region fallthrough
CT: control target
= control target key end

     0   :  { %6 = vsyncpa [#allocation3], 0  ;;  %s145_s0 = inlined_call_operand.hbm [shape: f32[1,384], index: 0, kind: input, shape index: {}]   ;;  %s146_s1 = inlined_call_operand.hbm [shape: f32[1,384], index: 1, kind: output, shape index: {}]  }
   0x1   :  { %7 = vsyncpa [#allocation4], 0  ;;  %s108_s6 = smov [#allocation2]   ;;  %s60_s10 = scalar_lea.hbm %s145_s0, 48 }
   0x2   :  { %s14_s7 = sshll.u32 %s108_s6, 4  ;;  %p61_p0 = scmp.ne.s32.totalorder %s145_s0, %s60_s10  ;;  %s15_s7 = int_to_ptr.vmem [resolvable:$true] %s14_s7 }
   0x3   :  { %p64_p1 = scmp.lt.u32.totalorder %s60_s10, %s145_s0 }
   0x5   :  { %p66_p2 = pnand %p64_p1, %p61_p0 }
   0x7   :  { %69 = shalt.err (!%p66_p2)
}
   0x8   :  { %s70_s15 = scalar_lea.vmem %s15_s7, 48  ;;  %s74_s16 = scalar_lea.vmem %s15_s7, 64 }
   0x9   :  { %p71_p3 = scmp.ne.s32.totalorder %s15_s7, %s70_s15  ;;  %p75_p4 = scmp.lt.s32.totalorder %s15_s7, %s15_s7 }
   0xa   :  { %p76_p5 = scmp.lt.s32.totalorder %s74_s16, %s70_s15 }
   0xc   :  { %p77_p6 = por %p76_p5, %p75_p4 }
   0xe   :  { %p78_p7 = pnand %p77_p6, %p71_p3 }
  0x10   :  { %81 = shalt.err (!%p78_p7)
}
  0x11   :  { %17 = dma.hbm_to_vmem [thread:$0]  %s145_s0, 48, %s15_s7, [#allocation3]  }
  0x12   :  { %104 = dma.done.wait [#allocation3], 48  }
  0x13   :  { %105 = vsyncadd [#allocation3], 4294967248  ;;  %v25_v0 = vlaneseq  ;;  %v109_v1 = vmov 0.0   ;;  %v32_v2 = vld [vmem:[#allocation2] sm:$0x7]  ;;  %s110_s19 = smov [#allocation5]  }
  0x14   :  { %v33_v3 = vand.u32 2147483647, %v32_v2  ;;  %s48_s20 = sshll.u32 %s110_s19, 4  ;;  %s49_s20 = int_to_ptr.vmem [resolvable:$true] %s48_s20 }
  0x15   :  { %vm27_vm0 = vcmp.lt.s32.totalorder %v25_v0, 384  ;;  %s82_s21 = scalar_lea.vmem %s49_s20, 48  ;;  %s86_s22 = scalar_lea.vmem %s49_s20, 64 }
  0x16   :  { %29 = vst.msk [vmem:[#allocation5] sm:$0x7] %vm27_vm0, %v109_v1  ;;  %p83_p8 = scmp.ne.s32.totalorder %s49_s20, %s82_s21  ;;  %p87_p9 = scmp.lt.s32.totalorder %s49_s20, %s49_s20 }
  0x17   :  { %p88_p10 = scmp.lt.s32.totalorder %s86_s22, %s82_s21 }
  0x19   :  { %p89_p11 = por %p88_p10, %p87_p9 }
  0x1b   :  { %p90_p12 = pnand %p89_p11, %p83_p8 }
  0x1d   :  { %v35_v4 = vld [vmem:[#allocation5] sm:$0x7] }
  0x1e   :  { %v36_v5 = vadd.f32 %v35_v4, %v33_v3 }
  0x20   :  { %41 = vst.msk [vmem:[#allocation5] sm:$0x7] %vm27_vm0, %v36_v5 }
  0x21   :  { %93 = shalt.err (!%p90_p12)
}
  0x22   :  { %s94_s24 = scalar_lea.hbm %s146_s1, 48 }
  0x23   :  { %p95_p13 = scmp.ne.s32.totalorder %s146_s1, %s94_s24  ;;  %p98_p0 = scmp.lt.u32.totalorder %s94_s24, %s146_s1 }
  0x25   :  { %p100_p1 = pnand %p98_p0, %p95_p13 }
  0x27   :  { %103 = shalt.err (!%p100_p1)
}
  0x28   :  { %51 = dma.vmem_to_hbm [thread:$0]  %s49_s20, 48, %s146_s1, [#allocation4]  }
  0x29   :  { %106 = dma.done.wait [#allocation4], 48  }
  0x2a   :  { %107 = vsyncadd [#allocation4], 4294967248 }
  0x2b   :  { %55 = vsyncpa [#allocation3], 1 }
  0x2c   :  { %56 = vsyncpa [#allocation4], 1 }

</bundles_post_ra>
